<compile_context>
chip_gen: v6e
topology: v6e:2x2x1
jax: 0.10.0
libtpu: 0.0.40
codegen_flags: <defaults>
</compile_context>

<pallas_src>
import functools

import jax
import jax.numpy as jnp
from jax.experimental import pallas as pl
from jax.experimental.pallas import tpu as pltpu

LANE = 128       # TPU lane width
TM_MAX = 4096    # rows per block -> (4096, 128) f32 = 2 MiB per input block


def _masked_sigmoid_l1_kernel(x_ref, t_ref, m_ref, num_ref, den_ref,
                              *, tm, rows, blocks_per_core, need_mask):
    inner = pl.program_id(1)

    # Zero the resident (1,1,128) output accumulators at the start of each
    # core's reduction (the output block index is constant along the inner
    # "arbitrary" axis, so it stays in VMEM until the axis finishes).
    @pl.when(inner == 0)
    def _():
        num_ref[...] = jnp.zeros_like(num_ref)
        den_ref[...] = jnp.zeros_like(den_ref)

    x = x_ref[...].astype(jnp.float32)
    t = t_ref[...].astype(jnp.float32)
    m = m_ref[...].astype(jnp.float32)

    # sigmoid(x) = 0.5 * (tanh(x/2) + 1): EUP transcendental, no VPU divide.
    p = 0.5 * (jnp.tanh(0.5 * x) + 1.0)
    num_c = jnp.abs(p - t) * m          # masked L1 contribution
    den_c = m

    def accumulate(num_blk, den_blk):
        # One block-local reduction per step; single-vreg accumulator RMW.
        num_ref[...] += jnp.sum(num_blk, axis=0, keepdims=True)[None]
        den_ref[...] += jnp.sum(den_blk, axis=0, keepdims=True)[None]

    if need_mask:
        # Unclamped block id: both the ragged last block and any clamped
        # (duplicated) block of the second core satisfy (bid+1)*tm > rows.
        bid = pl.program_id(0) * blocks_per_core + inner
        is_edge = (bid + 1) * tm > rows

        @pl.when(jnp.logical_not(is_edge))
        def _():
            accumulate(num_c, den_c)

        @pl.when(is_edge)
        def _():
            row_ids = bid * tm + jax.lax.broadcasted_iota(jnp.int32, num_c.shape, 0)
            valid = row_ids < rows
            # MUST stay a select (not a multiply): out-of-bounds rows of a
            # partial block hold unspecified data that may be NaN/Inf.
            accumulate(jnp.where(valid, num_c, 0.0),
                       jnp.where(valid, den_c, 0.0))
    else:
        accumulate(num_c, den_c)


def _num_parallel_cores():
    """2 on dual-TensorCore chips (v7x / megacore v4, v5p); 1 on v5e/v6e."""
    try:
        kind = jax.devices()[0].device_kind.lower()
    except Exception:
        return 1
    single_tc = any(s in kind for s in
                    ("v5e", "v5 lite", "v5lite", "v6e", "v6 lite", "v6lite",
                     "v2", "v3"))
    return 1 if single_tc else 2


def mse_loss_with_logits(prediction, targets, mask, *, tm_max=TM_MAX):
    """sum(|sigmoid(prediction) - targets| * mask) / (sum(mask) + 1e-8)."""
    assert prediction.shape == targets.shape == mask.shape
    n = prediction.size

    x = prediction.reshape(-1)
    t = targets.reshape(-1)
    m = mask.reshape(-1)

    # --- sub-128-element tail: tiny jnp reduction, no full-array pad/copy ----
    tail = n % LANE
    if tail:
        xt = x[n - tail:].astype(jnp.float32)
        tt = t[n - tail:].astype(jnp.float32)
        mt = m[n - tail:].astype(jnp.float32)
        tail_num = jnp.sum(jnp.abs(0.5 * (jnp.tanh(0.5 * xt) + 1.0) - tt) * mt)
        tail_den = jnp.sum(mt)
    else:
        tail_num = jnp.float32(0.0)
        tail_den = jnp.float32(0.0)

    rows = (n - tail) // LANE
    if rows == 0:                       # everything fit in the tail
        return tail_num / (tail_den + jnp.float32(1e-8))

    if tail:
        # Only the (rare) unaligned case slices off the aligned prefix; the
        # common aligned case reshapes the original buffers for free.
        x, t, m = x[: rows * LANE], t[: rows * LANE], m[: rows * LANE]
    x = x.reshape(rows, LANE)
    t = t.reshape(rows, LANE)
    m = m.reshape(rows, LANE)

    # tm is either TM_MAX (multiple of 32 -> ok for f32/bf16/int8 packing) or
    # the full row extent (always legal as a block dim).
    tm = min(tm_max, rows)
    nb = pl.cdiv(rows, tm)                       # total row-blocks
    nc = _num_parallel_cores() if nb >= 2 else 1 # parallel split (v7x/megacore)
    npc = pl.cdiv(nb, nc)                        # blocks per core
    need_mask = (nc * npc * tm != rows)          # ragged tail or clamped block

    def in_map(c, i):
        # Clamp so we never issue a fully out-of-bounds block DMA; clamped
        # (duplicate) blocks are zeroed by the in-kernel row mask.
        return (jnp.minimum(c * npc + i, nb - 1), 0)

    def out_map(c, i):
        return (c, 0, 0)

    kernel = functools.partial(
        _masked_sigmoid_l1_kernel,
        tm=tm, rows=rows, blocks_per_core=npc, need_mask=need_mask,
    )

    in_spec = pl.BlockSpec((tm, LANE), in_map)
    out_spec = pl.BlockSpec((1, 1, LANE), out_map)

    # 3 inputs x 2 pipeline buffers x (tm,128) blocks + tiny resident outputs.
    itemsize_sum = (jnp.dtype(prediction.dtype).itemsize
                    + jnp.dtype(targets.dtype).itemsize
                    + jnp.dtype(mask.dtype).itemsize)
    vmem_limit = int(min(48 << 20,
                         max(32 << 20, 2 * tm * LANE * itemsize_sum + (8 << 20))))

    num_out, den_out = pl.pallas_call(
        kernel,
        out_shape=(
            jax.ShapeDtypeStruct((nc, 1, LANE), jnp.float32),
            jax.ShapeDtypeStruct((nc, 1, LANE), jnp.float32),
        ),
        grid_spec=pltpu.PrefetchScalarGridSpec(
            num_scalar_prefetch=0,
            grid=(nc, npc),
            in_specs=[in_spec, in_spec, in_spec],
            out_specs=[out_spec, out_spec],
        ),
        compiler_params=pltpu.CompilerParams(
            dimension_semantics=("parallel", "arbitrary"),
            vmem_limit_bytes=vmem_limit,
        ),
    )(x, t, m)

    num = jnp.sum(num_out) + tail_num
    den = jnp.sum(den_out) + tail_den
    return num / (den + jnp.float32(1e-8))


def _reference(prediction, targets, mask):
    p = jax.nn.sigmoid(prediction.astype(jnp.float32))
    loss = jnp.abs(p - targets.astype(jnp.float32))
    m = mask.astype(jnp.float32)
    return jnp.sum(loss * m) / (jnp.sum(m) + jnp.float32(1e-8))


if __name__ == "__main__":
    key = jax.random.PRNGKey(0)
    k1, k2, k3 = jax.random.split(key, 3)

    # NCHW example: batch=2, channels=4, spatial=16x16 (2048 elems, aligned).
    shape = (2, 4, 16, 16)
    prediction = jax.random.normal(k1, shape, dtype=jnp.float32)        # logits
    targets = jax.random.uniform(k2, shape, dtype=jnp.float32)          # [0,1]
    mask = jax.random.bernoulli(k3, 0.7, shape).astype(jnp.float32)     # {0,1}

    out = jax.block_until_ready(mse_loss_with_logits(prediction, targets, mask))
    ref = _reference(prediction, targets, mask)
    assert jnp.allclose(out, ref, rtol=1e-5, atol=1e-5), (out, ref)

    # Multi-block / ragged-last-block / core-split path (tiny tm_max so the
    # multi-block machinery runs even at this small size).
    shape2 = (3, 1, 32, 32)
    p2 = jax.random.normal(k1, shape2, dtype=jnp.float32)
    t2 = jax.random.uniform(k2, shape2, dtype=jnp.float32)
    m2 = jax.random.bernoulli(k3, 0.5, shape2).astype(jnp.float32)
    out2 = jax.block_until_ready(mse_loss_with_logits(p2, t2, m2, tm_max=16))
    ref2 = _reference(p2, t2, m2)
    assert jnp.allclose(out2, ref2, rtol=1e-5, atol=1e-5), (out2, ref2)

    # Element count not a multiple of 128: exercises the pad-free tail path and
    # a single partial (non-multiple-of-8-rows) block.
    shape3 = (5, 3, 7, 11)   # 1155 elements
    p3 = jax.random.normal(k1, shape3, dtype=jnp.float32)
    t3 = jax.random.uniform(k2, shape3, dtype=jnp.float32)
    m3 = jax.random.bernoulli(k3, 0.6, shape3).astype(jnp.float32)
    out3 = jax.block_until_ready(mse_loss_with_logits(p3, t3, m3))
    ref3 = _reference(p3, t3, m3)
    assert jnp.allclose(out3, ref3, rtol=1e-5, atol=1e-5), (out3, ref3)

    print("KERNEL_OK")
</pallas_src>

<mosaic_0001>
module attributes {stable_mosaic.version = 11 : i64} {
  func.func @_masked_sigmoid_l1_kernel(%arg0: i32, %arg1: i32, %arg2: memref<16x128xf32, #tpu.memory_space<vmem>>, %arg3: memref<16x128xf32, #tpu.memory_space<vmem>>, %arg4: memref<16x128xf32, #tpu.memory_space<vmem>>, %arg5: memref<1x1x128xf32, #tpu.memory_space<vmem>>, %arg6: memref<1x1x128xf32, #tpu.memory_space<vmem>>) attributes {dimension_semantics = [#tpu.dimension_semantics<parallel>, #tpu.dimension_semantics<arbitrary>], iteration_bounds = array<i64: 1, 1>, scalar_prefetch = 0 : i64, scratch_operands = 0 : i64, tpu.core_type = #tpu.core_type<tc>, window_params = [{transform_indices = @transform_0, window_bounds = array<i64: 16, 128>}, {transform_indices = @transform_1, window_bounds = array<i64: 16, 128>}, {transform_indices = @transform_2, window_bounds = array<i64: 16, 128>}, {transform_indices = @transform_3, window_bounds = array<i64: 1, 1, 128>}, {transform_indices = @transform_4, window_bounds = array<i64: 1, 1, 128>}]} {
    %c0_i32 = arith.constant 0 : i32
    %0 = arith.cmpi eq, %arg1, %c0_i32 : i32
    %1 = arith.extui %0 : i1 to i32
    %c0_i32_0 = arith.constant 0 : i32
    %2 = arith.cmpi ne, %1, %c0_i32_0 : i32
    scf.if %2 {
      %cst_22 = arith.constant 0.000000e+00 : f32
      %28 = vector.broadcast %cst_22 : f32 to vector<1x1x128xf32>
      %c0_23 = arith.constant 0 : index
      %c0_24 = arith.constant 0 : index
      %c0_25 = arith.constant 0 : index
      %29 = vector.load %arg5[%c0_23, %c0_24, %c0_25] : memref<1x1x128xf32, #tpu.memory_space<vmem>>, vector<1x1x128xf32>
      tpu.vector_store %arg5[%c0_23, %c0_24, %c0_25], %28 {strides = array<i32>} : memref<1x1x128xf32, #tpu.memory_space<vmem>>, vector<1x1x128xf32>,
      %cst_26 = arith.constant 0.000000e+00 : f32
      %30 = vector.broadcast %cst_26 : f32 to vector<1x1x128xf32>
      %c0_27 = arith.constant 0 : index
      %c0_28 = arith.constant 0 : index
      %c0_29 = arith.constant 0 : index
      %31 = vector.load %arg6[%c0_27, %c0_28, %c0_29] : memref<1x1x128xf32, #tpu.memory_space<vmem>>, vector<1x1x128xf32>
      tpu.vector_store %arg6[%c0_27, %c0_28, %c0_29], %30 {strides = array<i32>} : memref<1x1x128xf32, #tpu.memory_space<vmem>>, vector<1x1x128xf32>,
    } else {
    }
    %c0 = arith.constant 0 : index
    %c0_1 = arith.constant 0 : index
    %3 = vector.load %arg2[%c0, %c0_1] : memref<16x128xf32, #tpu.memory_space<vmem>>, vector<16x128xf32>
    %c0_2 = arith.constant 0 : index
    %c0_3 = arith.constant 0 : index
    %4 = vector.load %arg3[%c0_2, %c0_3] : memref<16x128xf32, #tpu.memory_space<vmem>>, vector<16x128xf32>
    %c0_4 = arith.constant 0 : index
    %c0_5 = arith.constant 0 : index
    %5 = vector.load %arg4[%c0_4, %c0_5] : memref<16x128xf32, #tpu.memory_space<vmem>>, vector<16x128xf32>
    %cst = arith.constant 5.000000e-01 : f32
    %6 = vector.broadcast %cst : f32 to vector<16x128xf32>
    %7 = arith.mulf %6, %3 : vector<16x128xf32>
    %8 = math.tanh %7 : vector<16x128xf32>
    %cst_6 = arith.constant 1.000000e+00 : f32
    %9 = vector.broadcast %cst_6 : f32 to vector<16x128xf32>
    %10 = arith.addf %8, %9 : vector<16x128xf32>
    %cst_7 = arith.constant 5.000000e-01 : f32
    %11 = vector.broadcast %cst_7 : f32 to vector<16x128xf32>
    %12 = arith.mulf %11, %10 : vector<16x128xf32>
    %13 = arith.subf %12, %4 : vector<16x128xf32>
    %14 = math.absf %13 : vector<16x128xf32>
    %15 = arith.mulf %14, %5 : vector<16x128xf32>
    %c0_8 = arith.constant 0 : index
    %c0_9 = arith.constant 0 : index
    %c0_10 = arith.constant 0 : index
    %16 = vector.load %arg5[%c0_8, %c0_9, %c0_10] : memref<1x1x128xf32, #tpu.memory_space<vmem>>, vector<1x1x128xf32>
    %cst_11 = arith.constant dense<0.000000e+00> : vector<128xf32>
    %17 = vector.multi_reduction <add>, %15, %cst_11 [0] : vector<16x128xf32> to vector<128xf32>
    %18 = vector.shape_cast %17 : vector<128xf32> to vector<1x128xf32>
    %19 = vector.shape_cast %18 : vector<1x128xf32> to vector<1x1x128xf32>
    %20 = arith.addf %16, %19 : vector<1x1x128xf32>
    %c0_12 = arith.constant 0 : index
    %c0_13 = arith.constant 0 : index
    %c0_14 = arith.constant 0 : index
    %21 = vector.load %arg5[%c0_12, %c0_13, %c0_14] : memref<1x1x128xf32, #tpu.memory_space<vmem>>, vector<1x1x128xf32>
    tpu.vector_store %arg5[%c0_12, %c0_13, %c0_14], %20 {strides = array<i32>} : memref<1x1x128xf32, #tpu.memory_space<vmem>>, vector<1x1x128xf32>,
    %c0_15 = arith.constant 0 : index
    %c0_16 = arith.constant 0 : index
    %c0_17 = arith.constant 0 : index
    %22 = vector.load %arg6[%c0_15, %c0_16, %c0_17] : memref<1x1x128xf32, #tpu.memory_space<vmem>>, vector<1x1x128xf32>
    %cst_18 = arith.constant dense<0.000000e+00> : vector<128xf32>
    %23 = vector.multi_reduction <add>, %5, %cst_18 [0] : vector<16x128xf32> to vector<128xf32>
    %24 = vector.shape_cast %23 : vector<128xf32> to vector<1x128xf32>
    %25 = vector.shape_cast %24 : vector<1x128xf32> to vector<1x1x128xf32>
    %26 = arith.addf %22, %25 : vector<1x1x128xf32>
    %c0_19 = arith.constant 0 : index
    %c0_20 = arith.constant 0 : index
    %c0_21 = arith.constant 0 : index
    %27 = vector.load %arg6[%c0_19, %c0_20, %c0_21] : memref<1x1x128xf32, #tpu.memory_space<vmem>>, vector<1x1x128xf32>
    tpu.vector_store %arg6[%c0_19, %c0_20, %c0_21], %26 {strides = array<i32>} : memref<1x1x128xf32, #tpu.memory_space<vmem>>, vector<1x1x128xf32>,
    return
  }
  func.func @transform_0(%arg0: i32, %arg1: i32) -> (i32, i32) {
    %c1_i32 = arith.constant 1 : i32
    %0 = arith.muli %arg0, %c1_i32 : i32
    %1 = arith.addi %0, %arg1 : i32
    %c0_i32 = arith.constant 0 : i32
    %2 = arith.minsi %1, %c0_i32 : i32
    %c0_i32_0 = arith.constant 0 : i32
    %c0_i32_1 = arith.constant 0 : i32
    return %2, %c0_i32_0 : i32, i32
  }
  func.func @transform_1(%arg0: i32, %arg1: i32) -> (i32, i32) {
    %c1_i32 = arith.constant 1 : i32
    %0 = arith.muli %arg0, %c1_i32 : i32
    %1 = arith.addi %0, %arg1 : i32
    %c0_i32 = arith.constant 0 : i32
    %2 = arith.minsi %1, %c0_i32 : i32
    %c0_i32_0 = arith.constant 0 : i32
    %c0_i32_1 = arith.constant 0 : i32
    return %2, %c0_i32_0 : i32, i32
  }
  func.func @transform_2(%arg0: i32, %arg1: i32) -> (i32, i32) {
    %c1_i32 = arith.constant 1 : i32
    %0 = arith.muli %arg0, %c1_i32 : i32
    %1 = arith.addi %0, %arg1 : i32
    %c0_i32 = arith.constant 0 : i32
    %2 = arith.minsi %1, %c0_i32 : i32
    %c0_i32_0 = arith.constant 0 : i32
    %c0_i32_1 = arith.constant 0 : i32
    return %2, %c0_i32_0 : i32, i32
  }
  func.func @transform_3(%arg0: i32, %arg1: i32) -> (i32, i32, i32) {
    %c0_i32 = arith.constant 0 : i32
    %c0_i32_0 = arith.constant 0 : i32
    %c0_i32_1 = arith.constant 0 : i32
    return %arg0, %c0_i32, %c0_i32_0 : i32, i32, i32
  }
  func.func @transform_4(%arg0: i32, %arg1: i32) -> (i32, i32, i32) {
    %c0_i32 = arith.constant 0 : i32
    %c0_i32_0 = arith.constant 0 : i32
    %c0_i32_1 = arith.constant 0 : i32
    return %arg0, %c0_i32, %c0_i32_0 : i32, i32, i32
  }
}

</mosaic_0001>

<bundles_post_ra>
// kernel: tpu_custom_call.1
= control target key start
LH: loop header
LB: loop body
LE: loop exit
PB: predicated region body
PF: predicated region fallthrough
CT: control target
= control target key end

     0   :  { %10 = vsyncpa [#allocation3], 0  ;;  %s339_s0 = inlined_call_operand.hbm [shape: f32[16,128], index: 0, kind: input, shape index: {}]   ;;  %s340_s1 = inlined_call_operand.hbm [shape: f32[16,128], index: 1, kind: input, shape index: {}]   ;;  %s341_s2 = inlined_call_operand.hbm [shape: f32[16,128], index: 2, kind: input, shape index: {}]   ;;  %s342_s3 = inlined_call_operand.hbm [shape: f32[1,1,128], index: 3, kind: output, shape index: {0}]   ;;  %s343_s4 = inlined_call_operand.hbm [shape: f32[1,1,128], index: 4, kind: output, shape index: {1}]  }
   0x1   :  { %11 = vsyncpa [#allocation6], 0 }
   0x2   :  { %12 = vsyncpa [#allocation4], 0 }
   0x3   :  { %13 = vsyncpa [#allocation10], 0  ;;  %s291_s15 = smov [#allocation5]   ;;  %s292_s17 = smov [#allocation2]  }
   0x4   :  { %s43_s16 = sshll.u32 %s291_s15, 4  ;;  %s25_s18 = sshll.u32 %s292_s17, 4  ;;  %s44_s16 = int_to_ptr.vmem [resolvable:$true] %s43_s16  ;;  %s26_s18 = int_to_ptr.vmem [resolvable:$true] %s25_s18 }
   0x5   :  { %s191_s19 = scalar_lea.vmem %s44_s16, 256  ;;  %p196_p1 = scmp.lt.s32.totalorder %s44_s16, %s44_s16 }
   0x6   :  { %p192_p0 = scmp.ne.s32.totalorder %s44_s16, %s191_s19  ;;  %p197_p2 = scmp.lt.s32.totalorder %s191_s19, %s191_s19 }
   0x8   :  { %p198_p3 = por %p197_p2, %p196_p1 }
   0xa   :  { %p199_p4 = pnand %p198_p3, %p192_p0 }
   0xc   :  { %202 = shalt.err (!%p199_p4)
}
   0xd   :  { %s293_s20 = smov 128   ;;  %s294_s21 = smov 8  }
   0xe   :  { %49 = dma.hbm_to_vmem [thread:$0]  %s340_s1, 256, %s44_s16, [#allocation6], %s293_s20, %s293_s20, %s294_s21  }
   0xf   :  { %s211_s24 = scalar_lea.vmem %s26_s18, 256  ;;  %p216_p6 = scmp.lt.s32.totalorder %s26_s18, %s26_s18 }
  0x10   :  { %p212_p5 = scmp.ne.s32.totalorder %s26_s18, %s211_s24  ;;  %p217_p7 = scmp.lt.s32.totalorder %s211_s24, %s211_s24 }
  0x12   :  { %p218_p8 = por %p217_p7, %p216_p6 }
  0x14   :  { %p219_p9 = pnand %p218_p8, %p212_p5 }
  0x16   :  { %222 = shalt.err (!%p219_p9)
}
  0x17   :  { %31 = dma.hbm_to_vmem [thread:$0]  %s339_s0, 256, %s26_s18, [#allocation3], %s293_s20, %s293_s20, %s294_s21  }
  0x18   :  { %s295_s27 = smov [#allocation7]  }
  0x19   :  { %s61_s28 = sshll.u32 %s295_s27, 4  ;;  %s62_s28 = int_to_ptr.vmem [resolvable:$true] %s61_s28 }
  0x1a   :  { %s231_s29 = scalar_lea.vmem %s62_s28, 256  ;;  %p236_p11 = scmp.lt.s32.totalorder %s62_s28, %s62_s28 }
  0x1b   :  { %p232_p10 = scmp.ne.s32.totalorder %s62_s28, %s231_s29  ;;  %p237_p12 = scmp.lt.s32.totalorder %s231_s29, %s231_s29 }
  0x1d   :  { %p238_p13 = por %p237_p12, %p236_p11 }
  0x1f   :  { %p239_p0 = pnand %p238_p13, %p232_p10 }
  0x21   :  { %242 = shalt.err (!%p239_p0)
}
  0x22   :  { %67 = dma.hbm_to_vmem [thread:$0]  %s341_s2, 256, %s62_s28, [#allocation6], %s293_s20, %s293_s20, %s294_s21  }
  0x23   :  { %283 = dma.done.wait [#allocation3], 256  }
  0x24   :  { %284 = vsyncadd [#allocation3], 4294967040 }
  0x25   :  { %285 = dma.done.wait [#allocation6], 512  }
  0x26   :  { %286 = vsyncadd [#allocation6], 4294966784  ;;  %v296_v0 = vmov 0.0   ;;  %v95_v1 = vld [vmem:[#allocation2] sm:$0xff]  ;;  %v96_v2 = vld [vmem:[#allocation2 + $0x8] sm:$0xff]  ;;  %s297_s0 = smov [#allocation9]  }
  0x27   :  { %93 = vst [vmem:[#allocation8] sm:$0x1] %v296_v0  ;;  %94 = vst [vmem:[#allocation9] sm:$0x1] %v296_v0  ;;  %v99_v3 = vld [vmem:[#allocation7] sm:$0xff]  ;;  %v100_v4 = vld [vmem:[#allocation7 + $0x8] sm:$0xff] }
  0x28   :  { %v101_v5 = vmul.f32 0.5, %v95_v1  ;;  %v102_v6 = vmul.f32 0.5, %v96_v2  ;;  %v126_v7 = vadd.f32 %v100_v4, %v99_v3  ;;  %s151_s2 = sshll.u32 %s297_s0, 4  ;;  %v97_v19 = vld [vmem:[#allocation5] sm:$0xff]  ;;  %v98_v21 = vld [vmem:[#allocation5 + $0x8] sm:$0xff]  ;;  %s152_s2 = int_to_ptr.vmem [resolvable:$true] %s151_s2 }
  0x29   :  { %s243_s5 = scalar_lea.vmem %s152_s2, 16  ;;  %s247_s6 = scalar_lea.vmem %s152_s2, 32 }
  0x2a   :  { %179 = vtanh.f32 %v101_v5  ;;  %v127_v8 = vrot.slane %v126_v7, 4  ;;  %p244_p1 = scmp.ne.s32.totalorder %s152_s2, %s243_s5  ;;  %p248_p2 = scmp.lt.s32.totalorder %s152_s2, %s152_s2 }
  0x2b   :  { %181 = vtanh.f32 %v102_v6  ;;  %p249_p3 = scmp.lt.s32.totalorder %s247_s6, %s243_s5 }
  0x2c   :  { %v128_v9 = vadd.f32 %v127_v8, %v126_v7 }
  0x2d   :  { %p250_p4 = por %p249_p3, %p248_p2 }
  0x2e   :  { %v129_v10 = vrot.slane %v128_v9, 2  ;;  %v125_v13 = vld [vmem:[#allocation9] sm:$0x1] }
  0x2f   :  { %p251_p5 = pnand %p250_p4, %p244_p1 }
  0x30   :  { %v130_v11 = vadd.f32 %v129_v10, %v128_v9 }
  0x32   :  { %v131_v12 = vrot.slane %v130_v11, 1 }
  0x34   :  { %v132_v14 = vadd.f32 %v131_v12, %v130_v11 }
  0x36   :  { %v133_v16 = vadd.f32 %v132_v14, %v125_v13 }
  0x37   :  { %v180_v15 = vpop.eup %179 }
  0x38   :  { %v182_v17 = vpop.eup %181  ;;  %v105_v18 = vadd.f32 1.0, %v180_v15  ;;  %134 = vst [vmem:[#allocation9] sm:$0x1] %v133_v16 }
  0x39   :  { %v106_v20 = vadd.f32 1.0, %v182_v17 }
  0x3a   :  { %v107_v22 = vmul.f32 0.5, %v105_v18 }
  0x3b   :  { %254 = shalt.err (!%p251_p5)
}
  0x3c   :  { %154 = dma.vmem_to_hbm [thread:$0]  %s152_s2, 16, %s343_s4, [#allocation10]   ;;  %v108_v23 = vmul.f32 0.5, %v106_v20  ;;  %v109_v24 = vsub.f32 %v107_v22, %v97_v19  ;;  %v115_v36 = vld [vmem:[#allocation8] sm:$0x1] }
  0x3d   :  { %s298_s9 = smov [#allocation8]  }
  0x3e   :  { %v110_v25 = vsub.f32 %v108_v23, %v98_v21  ;;  %v111_v26 = vand.u32 2147483647, %v109_v24  ;;  %s141_s10 = sshll.u32 %s298_s9, 4  ;;  %s142_s10 = int_to_ptr.vmem [resolvable:$true] %s141_s10 }
  0x3f   :  { %s263_s4 = scalar_lea.vmem %s142_s10, 16  ;;  %s267_s11 = scalar_lea.vmem %s142_s10, 32 }
  0x40   :  { %v112_v27 = vand.u32 2147483647, %v110_v25  ;;  %v113_v28 = vmul.f32 %v111_v26, %v99_v3  ;;  %p264_p6 = scmp.ne.s32.totalorder %s142_s10, %s263_s4  ;;  %p268_p7 = scmp.lt.s32.totalorder %s142_s10, %s142_s10 }
  0x41   :  { %p269_p8 = scmp.lt.s32.totalorder %s267_s11, %s263_s4 }
  0x42   :  { %v114_v29 = vmul.f32 %v112_v27, %v100_v4 }
  0x43   :  { %p270_p9 = por %p269_p8, %p268_p7 }
  0x44   :  { %v116_v30 = vadd.f32 %v114_v29, %v113_v28 }
  0x45   :  { %p271_p10 = pnand %p270_p9, %p264_p6 }
  0x46   :  { %v117_v31 = vrot.slane %v116_v30, 4 }
  0x48   :  { %v118_v32 = vadd.f32 %v117_v31, %v116_v30 }
  0x4a   :  { %v119_v33 = vrot.slane %v118_v32, 2 }
  0x4c   :  { %v120_v34 = vadd.f32 %v119_v33, %v118_v32 }
  0x4e   :  { %v121_v35 = vrot.slane %v120_v34, 1 }
  0x50   :  { %v122_v37 = vadd.f32 %v121_v35, %v120_v34 }
  0x52   :  { %v123_v38 = vadd.f32 %v122_v37, %v115_v36 }
  0x54   :  { %124 = vst [vmem:[#allocation8] sm:$0x1] %v123_v38 }
  0x55   :  { %274 = shalt.err (!%p271_p10)
}
  0x56   :  { %144 = dma.vmem_to_hbm [thread:$0]  %s142_s10, 16, %s342_s3, [#allocation4]  }
  0x57   :  { %287 = dma.done.wait [#allocation4], 16  }
  0x58   :  { %288 = vsyncadd [#allocation4], 4294967280 }
  0x59   :  { %289 = dma.done.wait [#allocation10], 16  }
  0x5a   :  { %290 = vsyncadd [#allocation10], 4294967280 }
  0x5b   :  { %161 = vsyncpa [#allocation3], 1 }
  0x5c   :  { %162 = vsyncpa [#allocation6], 1 }
  0x5d   :  { %163 = vsyncpa [#allocation4], 1 }
  0x5e   :  { %164 = vsyncpa [#allocation10], 1 }

</bundles_post_ra>
